<compile_context>
chip_gen: v5e
topology: v5e:2x2
jax: 0.10.0
libtpu: 0.0.40
codegen_flags: <defaults>
</compile_context>

<pallas_src>
import functools

import jax
import jax.numpy as jnp
from jax.experimental import pallas as pl
from jax.experimental.pallas import tpu as pltpu

OUT_PAD = 128  # lane-dense padding of the 4-wide box output


# ----------------------------------------------------------------------------
# Single fused kernel: projections + cross-attention + prediction head
# ----------------------------------------------------------------------------
def fused_grounding_kernel(img_ref, tok_ref, wkvT_ref, bkv_ref, wq_ref, bq_ref,
                           w1_ref, b1_ref, g1_ref, be1_ref,
                           w2_ref, b2_ref, g2_ref, be2_ref,
                           w3p_ref, b3p_ref, o_ref, *, num_exp_tokens, scale):
    # img_ref : (B, C, S)    image as (channels, pixels) -- reshape of NCHW, f32
    # tok_ref : (B*T, H)     embedded expression tokens (first T per item), f32
    # wkvT    : (2H, C)      stacked [(vw@wk).T ; (vw@wv).T]  (1x1 conv folded)
    # bkv     : (2H, 1)      stacked [vb@wk + bk ; vb@wv + bv], f32
    # wq      : (H, H)       tw @ wq        (textual linear folded)
    # bq      : (1, H)       tb @ wq + bq, f32
    # w1..b3p : prediction-head params (w3p/b3p zero-padded to OUT_PAD lanes)
    # o_ref   : (B, OUT_PAD) sigmoid(pred) padded; wrapper slices [:, :4]
    B, C, S = img_ref.shape
    T = num_exp_tokens
    H = tok_ref.shape[1]
    eps = 1e-5
    cdt = wq_ref.dtype                       # compute dtype (bf16)

    # Queries for all B*T tokens in one matmul (packs sublanes better).
    q_all = jnp.dot(tok_ref[...].astype(cdt), wq_ref[...],
                    preferred_element_type=jnp.float32) + bq_ref[...]   # (B*T,H)

    wkvT = wkvT_ref[...]                     # (2H, C), bf16
    bkv = bkv_ref[...]                       # (2H, 1), f32

    rows = []
    for b in range(B):                       # static unroll, B is tiny
        x = img_ref[b].astype(cdt)           # (C, S), cast in-kernel
        # One MXU pass for the stacked K/V projection -> [K^T ; V^T] (2H, S).
        kvT = jnp.dot(wkvT, x, preferred_element_type=jnp.float32) + bkv
        kT = kvT[:H]                         # (H, S)
        vT = kvT[H:]                         # (H, S)

        q = q_all[b * T:(b + 1) * T]         # (T, H)
        # scores: hidden dim contracted directly against K^T (no transpose).
        s = jnp.dot(q.astype(cdt), kT.astype(cdt),
                    preferred_element_type=jnp.float32) * scale          # (T,S)

        # softmax in f32; reciprocal goes to the EUP slot.
        m = jnp.max(s, axis=-1, keepdims=True)
        e = jnp.exp(s - m)
        p = e * pl.reciprocal(jnp.sum(e, axis=-1, keepdims=True), approx=True)

        # out = p @ v  ==  p (T,S) · v^T (H,S) contracted over S -> (T, H)
        emb = jax.lax.dot_general(p.astype(cdt), vT.astype(cdt),
                                  (((1,), (1,)), ((), ())),
                                  preferred_element_type=jnp.float32)    # (T,H)

        # torch.cat([embed[:, i] for i in range(T)], dim=-1) for this item.
        rows.append(jnp.concatenate([emb[i:i + 1, :] for i in range(T)],
                                    axis=-1))                            # (1,T*H)
    x2 = jnp.concatenate(rows, axis=0)                                   # (B,T*H)

    # ---- prediction head (Linear/BN/ReLU x2 + Linear) + sigmoid, in VMEM ----
    def batchnorm(h, gamma, beta):
        # Training-mode BatchNorm1d (biased batch statistics) over the FULL
        # batch, which lives entirely in this one block.
        mu = jnp.mean(h, axis=0, keepdims=True)
        var = jnp.mean(jnp.square(h - mu), axis=0, keepdims=True)
        return gamma * (h - mu) * jax.lax.rsqrt(var + eps) + beta

    h = jnp.dot(x2.astype(cdt), w1_ref[...],
                preferred_element_type=jnp.float32) + b1_ref[...]
    h = jnp.maximum(batchnorm(h, g1_ref[...], be1_ref[...]), 0.0)

    h = jnp.dot(h.astype(cdt), w2_ref[...],
                preferred_element_type=jnp.float32) + b2_ref[...]
    h = jnp.maximum(batchnorm(h, g2_ref[...], be2_ref[...]), 0.0)

    z = jnp.dot(h.astype(cdt), w3p_ref[...],
                preferred_element_type=jnp.float32) + b3p_ref[...]       # (B,128)
    o_ref[...] = 1.0 / (1.0 + jnp.exp(-z))                               # sigmoid


# ----------------------------------------------------------------------------
# One-time parameter preprocessing (weight folding, stacking, padding, casts)
# ----------------------------------------------------------------------------
def fold_params(params, *, compute_dtype=jnp.bfloat16):
    """Hoisted out of the jitted forward; call once and reuse."""
    H = params["vw"].shape[1]
    f32 = jnp.float32
    cd = compute_dtype

    # k = (pix @ vw + vb) @ wk + bk == pix @ (vw@wk) + (vb@wk + bk), etc.
    wk_c = params["vw"] @ params["wk"]
    bk_c = params["vb"] @ params["wk"] + params["bk"]
    wv_c = params["vw"] @ params["wv"]
    bv_c = params["vb"] @ params["wv"] + params["bv"]
    wq_c = params["tw"] @ params["wq"]
    bq_c = params["tb"] @ params["wq"] + params["bq"]

    # Pad the final Linear(H -> 4) to OUT_PAD lanes (zeros) for a dense store.
    w3p = jnp.zeros((H, OUT_PAD), f32).at[:, :4].set(params["w3"])
    b3p = jnp.zeros((OUT_PAD,), f32).at[:4].set(params["b3"])

    return {
        "emb": params["emb"],                                            # f32
        "wkvT": jnp.concatenate([wk_c.T, wv_c.T], axis=0).astype(cd),    # (2H,C)
        "bkv": jnp.concatenate([bk_c, bv_c], axis=0).reshape(2 * H, 1).astype(f32),
        "wq": wq_c.astype(cd),
        "bq": bq_c.reshape(1, H).astype(f32),
        "w1": params["w1"].astype(cd),
        "b1": params["b1"].reshape(1, H).astype(f32),
        "g1": params["g1"].reshape(1, H).astype(f32),
        "be1": params["be1"].reshape(1, H).astype(f32),
        "w2": params["w2"].astype(cd),
        "b2": params["b2"].reshape(1, H).astype(f32),
        "g2": params["g2"].reshape(1, H).astype(f32),
        "be2": params["be2"].reshape(1, H).astype(f32),
        "w3p": w3p.astype(cd),
        "b3p": b3p.reshape(1, OUT_PAD).astype(f32),
    }


# ----------------------------------------------------------------------------
# Model
# ----------------------------------------------------------------------------
def init_params(key, *, in_channels, hidden_dim, num_exp_tokens, vocab_size):
    ks = jax.random.split(key, 12)
    s = 0.05
    return {
        # visual encoder (1x1 conv == per-pixel linear C -> hidden)
        "vw": jax.random.normal(ks[0], (in_channels, hidden_dim), jnp.float32) * s,
        "vb": jnp.zeros((hidden_dim,), jnp.float32),
        # textual encoder
        "emb": jax.random.normal(ks[1], (vocab_size, hidden_dim), jnp.float32) * s,
        "tw": jax.random.normal(ks[2], (hidden_dim, hidden_dim), jnp.float32) * s,
        "tb": jnp.zeros((hidden_dim,), jnp.float32),
        # vgtr (cross-attention projections)
        "wq": jax.random.normal(ks[3], (hidden_dim, hidden_dim), jnp.float32) * s,
        "wk": jax.random.normal(ks[4], (hidden_dim, hidden_dim), jnp.float32) * s,
        "wv": jax.random.normal(ks[5], (hidden_dim, hidden_dim), jnp.float32) * s,
        "bq": jnp.zeros((hidden_dim,), jnp.float32),
        "bk": jnp.zeros((hidden_dim,), jnp.float32),
        "bv": jnp.zeros((hidden_dim,), jnp.float32),
        # prediction head
        "w1": jax.random.normal(
            ks[6], (hidden_dim * num_exp_tokens, hidden_dim), jnp.float32) * s,
        "b1": jnp.zeros((hidden_dim,), jnp.float32),
        "g1": jnp.ones((hidden_dim,), jnp.float32),
        "be1": jnp.zeros((hidden_dim,), jnp.float32),
        "w2": jax.random.normal(ks[7], (hidden_dim, hidden_dim), jnp.float32) * s,
        "b2": jnp.zeros((hidden_dim,), jnp.float32),
        "g2": jnp.ones((hidden_dim,), jnp.float32),
        "be2": jnp.zeros((hidden_dim,), jnp.float32),
        "w3": jax.random.normal(ks[8], (hidden_dim, 4), jnp.float32) * s,
        "b3": jnp.zeros((4,), jnp.float32),
    }


def grounding_model_forward(fparams, img_nchw, expression_word_id, *,
                            num_exp_tokens):
    B, C, Hs, Ws = img_nchw.shape
    H = fparams["wq"].shape[1]
    S = Hs * Ws
    T = num_exp_tokens
    scale = 1.0 / float(H) ** 0.5

    # image: NCHW -> (B, C, H*W) is a pure reshape (no HBM transpose)
    img_bcs = img_nchw.reshape(B, C, S)

    # textual encoder: embedding lookup (XLA gather glue); only the first T
    # tokens feed the (simplified) vgtr / head. Flattened to (B*T, H).
    tok = jnp.take(fparams["emb"], expression_word_id[:, :T], axis=0)
    tok2 = tok.reshape(B * T, H)

    kernel = functools.partial(fused_grounding_kernel,
                               num_exp_tokens=T, scale=scale)
    # Single grid-less launch: every array is one whole block resident in VMEM
    # (BN needs the full batch; B*T*H is tiny). No megacore split at these
    # sizes -- reintroduce a parallel B grid axis only if per-item work grows
    # to >>10 us.
    out_pad = pl.pallas_call(
        kernel,
        out_shape=jax.ShapeDtypeStruct((B, OUT_PAD), jnp.float32),
        compiler_params=pltpu.CompilerParams(
            vmem_limit_bytes=32 * 1024 * 1024,   # safe for v7x's 64 MiB VMEM
        ),
    )(
        img_bcs, tok2,
        fparams["wkvT"], fparams["bkv"], fparams["wq"], fparams["bq"],
        fparams["w1"], fparams["b1"], fparams["g1"], fparams["be1"],
        fparams["w2"], fparams["b2"], fparams["g2"], fparams["be2"],
        fparams["w3p"], fparams["b3p"],
    )
    return out_pad[:, :4]


# ----------------------------------------------------------------------------
# Main
# ----------------------------------------------------------------------------
if __name__ == "__main__":
    B, C, Hs, Ws = 2, 4, 16, 16
    hidden_dim = 32
    num_exp_tokens = 2
    seq_len = 8
    vocab_size = 100

    key = jax.random.PRNGKey(0)
    k_img, k_ids, k_par = jax.random.split(key, 3)

    img = jax.random.normal(k_img, (B, C, Hs, Ws), jnp.float32)
    word_ids = jax.random.randint(k_ids, (B, seq_len), 0, vocab_size, jnp.int32)
    params = init_params(
        k_par,
        in_channels=C,
        hidden_dim=hidden_dim,
        num_exp_tokens=num_exp_tokens,
        vocab_size=vocab_size,
    )

    # One-time weight folding / stacking / padding (outside the jitted fwd).
    fparams = jax.tree.map(jax.block_until_ready,
                           fold_params(params, compute_dtype=jnp.bfloat16))

    fwd = jax.jit(functools.partial(grounding_model_forward,
                                    num_exp_tokens=num_exp_tokens))
    pred = jax.block_until_ready(fwd(fparams, img, word_ids))

    assert pred.shape == (B, 4)
    assert bool(jnp.all(jnp.isfinite(pred)))
    assert bool(jnp.all((pred >= 0.0) & (pred <= 1.0)))
    print("KERNEL_OK")
</pallas_src>

<mosaic_0001>
module attributes {stable_mosaic.version = 11 : i64} {
  func.func @fused_grounding_kernel(%arg0: memref<2x4x256xf32, #tpu.memory_space<vmem>>, %arg1: memref<4x32xf32, #tpu.memory_space<vmem>>, %arg2: memref<64x4xbf16, #tpu.memory_space<vmem>>, %arg3: memref<64x1xf32, #tpu.memory_space<vmem>>, %arg4: memref<32x32xbf16, #tpu.memory_space<vmem>>, %arg5: memref<1x32xf32, #tpu.memory_space<vmem>>, %arg6: memref<64x32xbf16, #tpu.memory_space<vmem>>, %arg7: memref<1x32xf32, #tpu.memory_space<vmem>>, %arg8: memref<1x32xf32, #tpu.memory_space<vmem>>, %arg9: memref<1x32xf32, #tpu.memory_space<vmem>>, %arg10: memref<32x32xbf16, #tpu.memory_space<vmem>>, %arg11: memref<1x32xf32, #tpu.memory_space<vmem>>, %arg12: memref<1x32xf32, #tpu.memory_space<vmem>>, %arg13: memref<1x32xf32, #tpu.memory_space<vmem>>, %arg14: memref<32x128xbf16, #tpu.memory_space<vmem>>, %arg15: memref<1x128xf32, #tpu.memory_space<vmem>>, %arg16: memref<2x128xf32, #tpu.memory_space<vmem>>) attributes {dimension_semantics = [], scalar_prefetch = 0 : i64, scratch_operands = 0 : i64, tpu.core_type = #tpu.core_type<tc>} {
    %c0 = arith.constant 0 : index
    %c0_0 = arith.constant 0 : index
    %0 = vector.load %arg1[%c0, %c0_0] : memref<4x32xf32, #tpu.memory_space<vmem>>, vector<4x32xf32>
    %1 = arith.truncf %0 : vector<4x32xf32> to vector<4x32xbf16>
    %c0_1 = arith.constant 0 : index
    %c0_2 = arith.constant 0 : index
    %2 = vector.load %arg4[%c0_1, %c0_2] : memref<32x32xbf16, #tpu.memory_space<vmem>>, vector<32x32xbf16>
    %cst = arith.constant dense<0.000000e+00> : vector<4x32xf32>
    %3 = tpu.matmul %1, %2, %cst {dimension_numbers = #tpu.dot_dimension_numbers<[1], [0], [0], [1], [0, 0, 1, 1], [], []>} : vector<4x32xbf16>, vector<32x32xbf16>, vector<4x32xf32> -> vector<4x32xf32>
    %c0_3 = arith.constant 0 : index
    %c0_4 = arith.constant 0 : index
    %4 = vector.load %arg5[%c0_3, %c0_4] : memref<1x32xf32, #tpu.memory_space<vmem>>, vector<1x32xf32>
    %5 = vector.broadcast %4 : vector<1x32xf32> to vector<4x32xf32>
    %6 = arith.addf %3, %5 : vector<4x32xf32>
    %c0_5 = arith.constant 0 : index
    %c0_6 = arith.constant 0 : index
    %7 = vector.load %arg2[%c0_5, %c0_6] : memref<64x4xbf16, #tpu.memory_space<vmem>>, vector<64x4xbf16>
    %c0_7 = arith.constant 0 : index
    %c0_8 = arith.constant 0 : index
    %8 = vector.load %arg3[%c0_7, %c0_8] : memref<64x1xf32, #tpu.memory_space<vmem>>, vector<64x1xf32>
    %c0_9 = arith.constant 0 : index
    %c0_10 = arith.constant 0 : index
    %c0_11 = arith.constant 0 : index
    %9 = vector.load %arg0[%c0_9, %c0_10, %c0_11] : memref<2x4x256xf32, #tpu.memory_space<vmem>>, vector<1x4x256xf32>
    %10 = vector.shape_cast %9 : vector<1x4x256xf32> to vector<4x256xf32>
    %11 = arith.truncf %10 : vector<4x256xf32> to vector<4x256xbf16>
    %cst_12 = arith.constant dense<0.000000e+00> : vector<64x256xf32>
    %12 = tpu.matmul %7, %11, %cst_12 {dimension_numbers = #tpu.dot_dimension_numbers<[1], [0], [0], [1], [0, 0, 1, 1], [], []>} : vector<64x4xbf16>, vector<4x256xbf16>, vector<64x256xf32> -> vector<64x256xf32>
    %13 = vector.broadcast %8 : vector<64x1xf32> to vector<64x256xf32>
    %14 = arith.addf %12, %13 : vector<64x256xf32>
    %15 = vector.extract_strided_slice %14 {offsets = [0, 0], sizes = [32, 256], strides = [1, 1]} : vector<64x256xf32> to vector<32x256xf32>
    %16 = vector.extract_strided_slice %14 {offsets = [32, 0], sizes = [32, 256], strides = [1, 1]} : vector<64x256xf32> to vector<32x256xf32>
    %17 = vector.extract_strided_slice %6 {offsets = [0, 0], sizes = [2, 32], strides = [1, 1]} : vector<4x32xf32> to vector<2x32xf32>
    %18 = arith.truncf %17 : vector<2x32xf32> to vector<2x32xbf16>
    %19 = arith.truncf %15 : vector<32x256xf32> to vector<32x256xbf16>
    %cst_13 = arith.constant dense<0.000000e+00> : vector<2x256xf32>
    %20 = tpu.matmul %18, %19, %cst_13 {dimension_numbers = #tpu.dot_dimension_numbers<[1], [0], [0], [1], [0, 0, 1, 1], [], []>} : vector<2x32xbf16>, vector<32x256xbf16>, vector<2x256xf32> -> vector<2x256xf32>
    %cst_14 = arith.constant 0.176776692 : f32
    %21 = vector.broadcast %cst_14 : f32 to vector<2x256xf32>
    %22 = arith.mulf %20, %21 : vector<2x256xf32>
    %cst_15 = arith.constant dense<0xFF800000> : vector<2xf32>
    %23 = vector.multi_reduction <maximumf>, %22, %cst_15 [1] : vector<2x256xf32> to vector<2xf32>
    %24 = vector.shape_cast %23 : vector<2xf32> to vector<2x1xf32>
    %25 = vector.broadcast %24 : vector<2x1xf32> to vector<2x256xf32>
    %26 = arith.subf %22, %25 : vector<2x256xf32>
    %27 = math.exp %26 : vector<2x256xf32>
    %cst_16 = arith.constant dense<0.000000e+00> : vector<2xf32>
    %28 = vector.multi_reduction <add>, %27, %cst_16 [1] : vector<2x256xf32> to vector<2xf32>
    %29 = vector.shape_cast %28 : vector<2xf32> to vector<2x1xf32>
    %30 = tpu.reciprocal %29 {approx = true} : vector<2x1xf32> -> vector<2x1xf32>
    %31 = vector.broadcast %30 : vector<2x1xf32> to vector<2x256xf32>
    %32 = arith.mulf %27, %31 : vector<2x256xf32>
    %33 = arith.truncf %32 : vector<2x256xf32> to vector<2x256xbf16>
    %34 = arith.truncf %16 : vector<32x256xf32> to vector<32x256xbf16>
    %cst_17 = arith.constant dense<0.000000e+00> : vector<2x32xf32>
    %35 = tpu.matmul %33, %34, %cst_17 {dimension_numbers = #tpu.dot_dimension_numbers<[1], [1], [0], [0], [0, 0, 1, 0], [], []>} : vector<2x256xbf16>, vector<32x256xbf16>, vector<2x32xf32> -> vector<2x32xf32>
    %36 = vector.extract_strided_slice %35 {offsets = [0, 0], sizes = [1, 32], strides = [1, 1]} : vector<2x32xf32> to vector<1x32xf32>
    %37 = vector.extract_strided_slice %35 {offsets = [1, 0], sizes = [1, 32], strides = [1, 1]} : vector<2x32xf32> to vector<1x32xf32>
    %38 = tpu.concatenate %36, %37 in 1 : vector<1x32xf32>, vector<1x32xf32> -> vector<1x64xf32>
    %c1 = arith.constant 1 : index
    %c0_18 = arith.constant 0 : index
    %c0_19 = arith.constant 0 : index
    %39 = vector.load %arg0[%c1, %c0_18, %c0_19] : memref<2x4x256xf32, #tpu.memory_space<vmem>>, vector<1x4x256xf32>
    %40 = vector.shape_cast %39 : vector<1x4x256xf32> to vector<4x256xf32>
    %41 = arith.truncf %40 : vector<4x256xf32> to vector<4x256xbf16>
    %cst_20 = arith.constant dense<0.000000e+00> : vector<64x256xf32>
    %42 = tpu.matmul %7, %41, %cst_20 {dimension_numbers = #tpu.dot_dimension_numbers<[1], [0], [0], [1], [0, 0, 1, 1], [], []>} : vector<64x4xbf16>, vector<4x256xbf16>, vector<64x256xf32> -> vector<64x256xf32>
    %43 = vector.broadcast %8 : vector<64x1xf32> to vector<64x256xf32>
    %44 = arith.addf %42, %43 : vector<64x256xf32>
    %45 = vector.extract_strided_slice %44 {offsets = [0, 0], sizes = [32, 256], strides = [1, 1]} : vector<64x256xf32> to vector<32x256xf32>
    %46 = vector.extract_strided_slice %44 {offsets = [32, 0], sizes = [32, 256], strides = [1, 1]} : vector<64x256xf32> to vector<32x256xf32>
    %47 = vector.extract_strided_slice %6 {offsets = [2, 0], sizes = [2, 32], strides = [1, 1]} : vector<4x32xf32> to vector<2x32xf32>
    %48 = arith.truncf %47 : vector<2x32xf32> to vector<2x32xbf16>
    %49 = arith.truncf %45 : vector<32x256xf32> to vector<32x256xbf16>
    %cst_21 = arith.constant dense<0.000000e+00> : vector<2x256xf32>
    %50 = tpu.matmul %48, %49, %cst_21 {dimension_numbers = #tpu.dot_dimension_numbers<[1], [0], [0], [1], [0, 0, 1, 1], [], []>} : vector<2x32xbf16>, vector<32x256xbf16>, vector<2x256xf32> -> vector<2x256xf32>
    %cst_22 = arith.constant 0.176776692 : f32
    %51 = vector.broadcast %cst_22 : f32 to vector<2x256xf32>
    %52 = arith.mulf %50, %51 : vector<2x256xf32>
    %cst_23 = arith.constant dense<0xFF800000> : vector<2xf32>
    %53 = vector.multi_reduction <maximumf>, %52, %cst_23 [1] : vector<2x256xf32> to vector<2xf32>
    %54 = vector.shape_cast %53 : vector<2xf32> to vector<2x1xf32>
    %55 = vector.broadcast %54 : vector<2x1xf32> to vector<2x256xf32>
    %56 = arith.subf %52, %55 : vector<2x256xf32>
    %57 = math.exp %56 : vector<2x256xf32>
    %cst_24 = arith.constant dense<0.000000e+00> : vector<2xf32>
    %58 = vector.multi_reduction <add>, %57, %cst_24 [1] : vector<2x256xf32> to vector<2xf32>
    %59 = vector.shape_cast %58 : vector<2xf32> to vector<2x1xf32>
    %60 = tpu.reciprocal %59 {approx = true} : vector<2x1xf32> -> vector<2x1xf32>
    %61 = vector.broadcast %60 : vector<2x1xf32> to vector<2x256xf32>
    %62 = arith.mulf %57, %61 : vector<2x256xf32>
    %63 = arith.truncf %62 : vector<2x256xf32> to vector<2x256xbf16>
    %64 = arith.truncf %46 : vector<32x256xf32> to vector<32x256xbf16>
    %cst_25 = arith.constant dense<0.000000e+00> : vector<2x32xf32>
    %65 = tpu.matmul %63, %64, %cst_25 {dimension_numbers = #tpu.dot_dimension_numbers<[1], [1], [0], [0], [0, 0, 1, 0], [], []>} : vector<2x256xbf16>, vector<32x256xbf16>, vector<2x32xf32> -> vector<2x32xf32>
    %66 = vector.extract_strided_slice %65 {offsets = [0, 0], sizes = [1, 32], strides = [1, 1]} : vector<2x32xf32> to vector<1x32xf32>
    %67 = vector.extract_strided_slice %65 {offsets = [1, 0], sizes = [1, 32], strides = [1, 1]} : vector<2x32xf32> to vector<1x32xf32>
    %68 = tpu.concatenate %66, %67 in 1 : vector<1x32xf32>, vector<1x32xf32> -> vector<1x64xf32>
    %69 = tpu.concatenate %38, %68 in 0 : vector<1x64xf32>, vector<1x64xf32> -> vector<2x64xf32>
    %70 = arith.truncf %69 : vector<2x64xf32> to vector<2x64xbf16>
    %c0_26 = arith.constant 0 : index
    %c0_27 = arith.constant 0 : index
    %71 = vector.load %arg6[%c0_26, %c0_27] : memref<64x32xbf16, #tpu.memory_space<vmem>>, vector<64x32xbf16>
    %cst_28 = arith.constant dense<0.000000e+00> : vector<2x32xf32>
    %72 = tpu.matmul %70, %71, %cst_28 {dimension_numbers = #tpu.dot_dimension_numbers<[1], [0], [0], [1], [0, 0, 1, 1], [], []>} : vector<2x64xbf16>, vector<64x32xbf16>, vector<2x32xf32> -> vector<2x32xf32>
    %c0_29 = arith.constant 0 : index
    %c0_30 = arith.constant 0 : index
    %73 = vector.load %arg7[%c0_29, %c0_30] : memref<1x32xf32, #tpu.memory_space<vmem>>, vector<1x32xf32>
    %74 = vector.broadcast %73 : vector<1x32xf32> to vector<2x32xf32>
    %75 = arith.addf %72, %74 : vector<2x32xf32>
    %c0_31 = arith.constant 0 : index
    %c0_32 = arith.constant 0 : index
    %76 = vector.load %arg8[%c0_31, %c0_32] : memref<1x32xf32, #tpu.memory_space<vmem>>, vector<1x32xf32>
    %c0_33 = arith.constant 0 : index
    %c0_34 = arith.constant 0 : index
    %77 = vector.load %arg9[%c0_33, %c0_34] : memref<1x32xf32, #tpu.memory_space<vmem>>, vector<1x32xf32>
    %cst_35 = arith.constant dense<0.000000e+00> : vector<32xf32>
    %78 = vector.multi_reduction <add>, %75, %cst_35 [0] : vector<2x32xf32> to vector<32xf32>
    %79 = vector.shape_cast %78 : vector<32xf32> to vector<1x32xf32>
    %cst_36 = arith.constant 2.000000e+00 : f32
    %80 = vector.broadcast %cst_36 : f32 to vector<1x32xf32>
    %81 = arith.divf %79, %80 : vector<1x32xf32>
    %82 = vector.broadcast %81 : vector<1x32xf32> to vector<2x32xf32>
    %83 = arith.subf %75, %82 : vector<2x32xf32>
    %84 = arith.mulf %83, %83 : vector<2x32xf32>
    %cst_37 = arith.constant dense<0.000000e+00> : vector<32xf32>
    %85 = vector.multi_reduction <add>, %84, %cst_37 [0] : vector<2x32xf32> to vector<32xf32>
    %86 = vector.shape_cast %85 : vector<32xf32> to vector<1x32xf32>
    %cst_38 = arith.constant 2.000000e+00 : f32
    %87 = vector.broadcast %cst_38 : f32 to vector<1x32xf32>
    %88 = arith.divf %86, %87 : vector<1x32xf32>
    %89 = vector.broadcast %81 : vector<1x32xf32> to vector<2x32xf32>
    %90 = arith.subf %75, %89 : vector<2x32xf32>
    %91 = vector.broadcast %76 : vector<1x32xf32> to vector<2x32xf32>
    %92 = arith.mulf %91, %90 : vector<2x32xf32>
    %cst_39 = arith.constant 9.99999974E-6 : f32
    %93 = vector.broadcast %cst_39 : f32 to vector<1x32xf32>
    %94 = arith.addf %88, %93 : vector<1x32xf32>
    %95 = math.rsqrt %94 : vector<1x32xf32>
    %96 = vector.broadcast %95 : vector<1x32xf32> to vector<2x32xf32>
    %97 = arith.mulf %92, %96 : vector<2x32xf32>
    %98 = vector.broadcast %77 : vector<1x32xf32> to vector<2x32xf32>
    %99 = arith.addf %97, %98 : vector<2x32xf32>
    %cst_40 = arith.constant 0.000000e+00 : f32
    %100 = vector.broadcast %cst_40 : f32 to vector<2x32xf32>
    %101 = arith.maximumf %99, %100 : vector<2x32xf32>
    %102 = arith.truncf %101 : vector<2x32xf32> to vector<2x32xbf16>
    %c0_41 = arith.constant 0 : index
    %c0_42 = arith.constant 0 : index
    %103 = vector.load %arg10[%c0_41, %c0_42] : memref<32x32xbf16, #tpu.memory_space<vmem>>, vector<32x32xbf16>
    %cst_43 = arith.constant dense<0.000000e+00> : vector<2x32xf32>
    %104 = tpu.matmul %102, %103, %cst_43 {dimension_numbers = #tpu.dot_dimension_numbers<[1], [0], [0], [1], [0, 0, 1, 1], [], []>} : vector<2x32xbf16>, vector<32x32xbf16>, vector<2x32xf32> -> vector<2x32xf32>
    %c0_44 = arith.constant 0 : index
    %c0_45 = arith.constant 0 : index
    %105 = vector.load %arg11[%c0_44, %c0_45] : memref<1x32xf32, #tpu.memory_space<vmem>>, vector<1x32xf32>
    %106 = vector.broadcast %105 : vector<1x32xf32> to vector<2x32xf32>
    %107 = arith.addf %104, %106 : vector<2x32xf32>
    %c0_46 = arith.constant 0 : index
    %c0_47 = arith.constant 0 : index
    %108 = vector.load %arg12[%c0_46, %c0_47] : memref<1x32xf32, #tpu.memory_space<vmem>>, vector<1x32xf32>
    %c0_48 = arith.constant 0 : index
    %c0_49 = arith.constant 0 : index
    %109 = vector.load %arg13[%c0_48, %c0_49] : memref<1x32xf32, #tpu.memory_space<vmem>>, vector<1x32xf32>
    %cst_50 = arith.constant dense<0.000000e+00> : vector<32xf32>
    %110 = vector.multi_reduction <add>, %107, %cst_50 [0] : vector<2x32xf32> to vector<32xf32>
    %111 = vector.shape_cast %110 : vector<32xf32> to vector<1x32xf32>
    %cst_51 = arith.constant 2.000000e+00 : f32
    %112 = vector.broadcast %cst_51 : f32 to vector<1x32xf32>
    %113 = arith.divf %111, %112 : vector<1x32xf32>
    %114 = vector.broadcast %113 : vector<1x32xf32> to vector<2x32xf32>
    %115 = arith.subf %107, %114 : vector<2x32xf32>
    %116 = arith.mulf %115, %115 : vector<2x32xf32>
    %cst_52 = arith.constant dense<0.000000e+00> : vector<32xf32>
    %117 = vector.multi_reduction <add>, %116, %cst_52 [0] : vector<2x32xf32> to vector<32xf32>
    %118 = vector.shape_cast %117 : vector<32xf32> to vector<1x32xf32>
    %cst_53 = arith.constant 2.000000e+00 : f32
    %119 = vector.broadcast %cst_53 : f32 to vector<1x32xf32>
    %120 = arith.divf %118, %119 : vector<1x32xf32>
    %121 = vector.broadcast %113 : vector<1x32xf32> to vector<2x32xf32>
    %122 = arith.subf %107, %121 : vector<2x32xf32>
    %123 = vector.broadcast %108 : vector<1x32xf32> to vector<2x32xf32>
    %124 = arith.mulf %123, %122 : vector<2x32xf32>
    %cst_54 = arith.constant 9.99999974E-6 : f32
    %125 = vector.broadcast %cst_54 : f32 to vector<1x32xf32>
    %126 = arith.addf %120, %125 : vector<1x32xf32>
    %127 = math.rsqrt %126 : vector<1x32xf32>
    %128 = vector.broadcast %127 : vector<1x32xf32> to vector<2x32xf32>
    %129 = arith.mulf %124, %128 : vector<2x32xf32>
    %130 = vector.broadcast %109 : vector<1x32xf32> to vector<2x32xf32>
    %131 = arith.addf %129, %130 : vector<2x32xf32>
    %cst_55 = arith.constant 0.000000e+00 : f32
    %132 = vector.broadcast %cst_55 : f32 to vector<2x32xf32>
    %133 = arith.maximumf %131, %132 : vector<2x32xf32>
    %134 = arith.truncf %133 : vector<2x32xf32> to vector<2x32xbf16>
    %c0_56 = arith.constant 0 : index
    %c0_57 = arith.constant 0 : index
    %135 = vector.load %arg14[%c0_56, %c0_57] : memref<32x128xbf16, #tpu.memory_space<vmem>>, vector<32x128xbf16>
    %cst_58 = arith.constant dense<0.000000e+00> : vector<2x128xf32>
    %136 = tpu.matmul %134, %135, %cst_58 {dimension_numbers = #tpu.dot_dimension_numbers<[1], [0], [0], [1], [0, 0, 1, 1], [], []>} : vector<2x32xbf16>, vector<32x128xbf16>, vector<2x128xf32> -> vector<2x128xf32>
    %c0_59 = arith.constant 0 : index
    %c0_60 = arith.constant 0 : index
    %137 = vector.load %arg15[%c0_59, %c0_60] : memref<1x128xf32, #tpu.memory_space<vmem>>, vector<1x128xf32>
    %138 = vector.broadcast %137 : vector<1x128xf32> to vector<2x128xf32>
    %139 = arith.addf %136, %138 : vector<2x128xf32>
    %cst_61 = arith.constant 0.000000e+00 : f32
    %140 = vector.broadcast %cst_61 : f32 to vector<2x128xf32>
    %141 = arith.subf %140, %139 : vector<2x128xf32>
    %142 = math.exp %141 : vector<2x128xf32>
    %cst_62 = arith.constant 1.000000e+00 : f32
    %143 = vector.broadcast %cst_62 : f32 to vector<2x128xf32>
    %144 = arith.addf %143, %142 : vector<2x128xf32>
    %cst_63 = arith.constant 1.000000e+00 : f32
    %145 = vector.broadcast %cst_63 : f32 to vector<2x128xf32>
    %146 = arith.divf %145, %144 : vector<2x128xf32>
    %c0_64 = arith.constant 0 : index
    %c0_65 = arith.constant 0 : index
    %147 = vector.load %arg16[%c0_64, %c0_65] : memref<2x128xf32, #tpu.memory_space<vmem>>, vector<2x128xf32>
    tpu.vector_store %arg16[%c0_64, %c0_65], %146 {strides = array<i32>} : memref<2x128xf32, #tpu.memory_space<vmem>>, vector<2x128xf32>,
    return
  }
}

</mosaic_0001>

<bundles_post_ra>
// kernel: grounding_model_forward.1
= control target key start
LH: loop header
LB: loop body
LE: loop exit
PB: predicated region body
PF: predicated region fallthrough
CT: control target
= control target key end

     0   :  { %s1253_s0 = inlined_call_operand.vmem [shape: f32[2,4,256], index: 0, kind: input, shape index: {}]   ;;  %s1254_s1 = inlined_call_operand.vmem [shape: f32[4,32], index: 1, kind: input, shape index: {}]   ;;  %s1255_s2 = inlined_call_operand.vmem [shape: bf16[64,4], index: 2, kind: input, shape index: {}]   ;;  %s1256_s3 = inlined_call_operand.vmem [shape: f32[64,1], index: 3, kind: input, shape index: {}]   ;;  %s1257_s4 = inlined_call_operand.vmem [shape: bf16[32,32], index: 4, kind: input, shape index: {}]   ;;  %s1258_s5 = inlined_call_operand.vmem [shape: f32[1,32], index: 5, kind: input, shape index: {}]   ;;  %s1259_s6 = inlined_call_operand.vmem [shape: bf16[64,32], index: 6, kind: input, shape index: {}]   ;;  %s1260_s7 = inlined_call_operand.vmem [shape: f32[1,32], index: 7, kind: input, shape index: {}]   ;;  %s1261_s8 = inlined_call_operand.vmem [shape: f32[1,32], index: 8, kind: input, shape index: {}]   ;;  %s1262_s9 = inlined_call_operand.vmem [shape: f32[1,32], index: 9, kind: input, shape index: {}]   ;;  %s1263_s10 = inlined_call_operand.vmem [shape: bf16[32,32], index: 10, kind: input, shape index: {}]   ;;  %s1264_s11 = inlined_call_operand.vmem [shape: f32[1,32], index: 11, kind: input, shape index: {}]   ;;  %s1265_s12 = inlined_call_operand.vmem [shape: f32[1,32], index: 12, kind: input, shape index: {}]   ;;  %s1266_s13 = inlined_call_operand.vmem [shape: f32[1,32], index: 13, kind: input, shape index: {}]   ;;  %s1267_s14 = inlined_call_operand.vmem [shape: bf16[32,128], index: 14, kind: input, shape index: {}]   ;;  %s1268_s15 = inlined_call_operand.vmem [shape: f32[1,128], index: 15, kind: input, shape index: {}]   ;;  %s1269_s16 = inlined_call_operand.hbm [shape: f32[2,128], index: 16, kind: output, shape index: {}]  }
   0x1   :  { %1271 = sst [smem:[#allocation5_spill]] %s1253_s0 }
   0x2   :  { %v104_v0 = vld [vmem:[%s1256_s3 + $0x10] sm:$0xff]  ;;  %s1272_s25 = sld [smem:[#allocation5_spill]]  ;;  %v940_v2 = vmov 0   ;;  %v102_v3 = vld [vmem:[%s1256_s3] sm:$0xff]  ;;  %v859_v4 = vld [vmem:[%s1257_s4 + $0x8] sm:$0xff]  ;;  %vm192_vm0 = vcmask 1041408  }
   0x3   :  { %876 = vset.pattern.permute.xlu0 %v940_v2  ;;  %877 = vset.pattern.permute.xlu1 %v940_v2  ;;  %v858_v6 = vld [vmem:[%s1257_s4] sm:$0xff]  ;;  %vm77_vm1 = vcmask 261120   ;;  %v105_v8 = vld [vmem:[%s1256_s3 + $0x18] sm:$0xff]  ;;  %v103_v9 = vld [vmem:[%s1256_s3 + $0x8] sm:$0xff] }
   0x4   :  { %131 = vperm.xlu0 %876, %v104_v0   ;;  %878 = vset.pattern.permute.xlu2 %v940_v2  ;;  %v55_v7 = vld [vmem:[%s1254_s1] sm:$0xf] }
   0x5   :  { %121 = vperm.xlu1 %877, %v102_v3   ;;  %87 = vmatpush.bf16.msra.mxu0 %v859_v4  ;;  %v56_v10 = vpack.c.bf16 %v55_v7, %v55_v7 }
   0x8   :  { %v110_v1 = vld [vmem:[%s1272_s25] sm:$0xff]  ;;  %v812_v5 = vld [vmem:[%s1272_s25 + $0x8] sm:$0xff] }
   0x9   :  { %112 = vst [vmem:[#allocation1] ss:$2 sm:$0xff] %v110_v1 }
   0xa   :  { %21 = vsyncpa [#allocation3], 0  ;;  %88 = vmatpush.bf16.msra.mxu0 %v858_v6  ;;  %v1061_v17 = vld [vmem:[%s1255_s2] sm:$0xff]  ;;  %vm179_vm2 = vcmask 31744   ;;  %v109_v18 = vld [vmem:[%s1256_s3 + $0x38] sm:$0xff]  ;;  %s941_s25 = smov 32  }
   0xb   :  { %v106_v19 = vld [vmem:[%s1256_s3 + $0x20] sm:$0xff]  ;;  %v1077_v20 = vld [vmem:[%s1255_s2 + $0x8] sm:$0xff]  ;;  %v1089_v22 = vld [vmem:[%s1255_s2 + $0x10] sm:$0xff]  ;;  %vm521_vm3 = vcmask 1040384   ;;  %vm560_vm4 = vcmask 523264   ;;  %vm579_vm5 = vcmask 254976  }
   0xc   :  { %136 = vperm.xlu0 %876, %v105_v8   ;;  %v107_v21 = vld [vmem:[%s1256_s3 + $0x28] sm:$0xff]  ;;  %v1098_v23 = vld [vmem:[%s1255_s2 + $0x18] sm:$0xff]  ;;  %v884_v36 = vld [vmem:[%s1258_s5] ss:$0 sm:$0xff]  ;;  %s768_s26 = sshll.u32 %s1269_s16, 4  ;;  %s769_s26 = int_to_ptr.hbm [resolvable:$true] %s768_s26 }
   0xd   :  { %126 = vperm.xlu1 %877, %v103_v9   ;;  %785 = vmatmul.msk.bf16.vlgmr.msra.gmra.mxu0 %vm77_vm1, %v56_v10  ;;  %v108_v62 = vld [vmem:[%s1256_s3 + $0x30] sm:$0xff] }
  0x10   :  { %v113_v11 = vld.sshfl [vmem:[#allocation1] sm:$0xff pattern:$0x75316420]  ;;  %v114_v12 = vld.sshfl [vmem:[#allocation1 + $0x8] sm:$0xff pattern:$0x75316420] }
  0x11   :  { %v117_v13 = vpack.c.bf16 %v113_v11, %v113_v11  ;;  %v118_v14 = vpack.c.bf16 %v114_v12, %v114_v12  ;;  %353 = vst [vmem:[#allocation1] ss:$2 sm:$0xff] %v812_v5 }
  0x13   :  { %v194_v15 = vsel %vm192_vm0, %v117_v13, 0  ;;  %v197_v16 = vsel %vm192_vm0, %v118_v14, 0 }
  0x14   :  { %206 = vmatpush.bf16.msra.mxu1 %v194_v15  ;;  %235 = vmatpush.bf16.msra.mxu2 %v197_v16 }
  0x15   :  { %156 = vperm.xlu0 %876, %v109_v18  }
  0x17   :  { %802 = vmatmul.msk.bf16.vlgmr.msra.gmra.mxu1 %vm179_vm2, %v1061_v17  ;;  %806 = vmatmul.msk.bf16.vlgmr.msra.gmra.mxu2 %vm179_vm2, %v1061_v17 }
  0x1d   :  { %141 = vperm.xlu0 %876, %v106_v19  }
  0x25   :  { %146 = vperm.xlu0 %876, %v107_v21  }
  0x27   :  { %803 = vmatmul.msk.bf16.gmra.mxu1 %vm179_vm2, %v1077_v20  ;;  %807 = vmatmul.msk.bf16.gmra.mxu2 %vm179_vm2, %v1077_v20 }
  0x37   :  { %804 = vmatmul.msk.bf16.gmra.mxu1 %vm179_vm2, %v1089_v22  ;;  %808 = vmatmul.msk.bf16.gmra.mxu2 %vm179_vm2, %v1089_v22 }
  0x47   :  { %805 = vmatmul.msk.bf16.gmra.mxu1 %vm179_vm2, %v1098_v23  ;;  %809 = vmatmul.msk.bf16.gmra.mxu2 %vm179_vm2, %v1098_v23 }
  0x76   :  { %v1104_v29 = vpop.permute.xlu0 %131 }
  0x77   :  { %v1106_v30 = vpop.permute.xlu1 %121 }
  0x7e   :  { %v1108_v34 = vpop.permute.xlu0 %136 }
  0x7f   :  { %v1110_v35 = vpop.permute.xlu1 %126 }
  0x87   :  { %v1134_v3 = vpop.permute.xlu0 %156 }
  0x8a   :  { %v90_v24 = vpop.f32.mrf.mxu0 }
  0x8b   :  { %v91_v42 = vadd.f32 %v884_v36, %v90_v24 }
  0x8d   :  { %v1121_v48 = vpack.c.bf16 %v91_v42, %v91_v42  ;;  %v355_v42 = vld.sshfl [vmem:[#allocation1 + $0x8] sm:$0xff pattern:$0x75316420] }
  0x8f   :  { %v1136_v11 = vpop.permute.xlu0 %141 }
  0x92   :  { %v92_v26 = vpop.f32.mrf.mxu0 }
  0x94   :  { %v208_v25 = vpop.f32.mrf.mxu1 }
  0x95   :  { %v209_v43 = vadd.f32 %v208_v25, %v1106_v30 }
  0x9a   :  { %v237_v27 = vpop.f32.mrf.mxu2 }
  0x9b   :  { %v238_v51 = vadd.f32 %v237_v27, %v1106_v30 }
  0x9c   :  { %v210_v28 = vpop.f32.mrf.mxu1 }
  0x9d   :  { %v211_v40 = vadd.f32 %v210_v28, %v1110_v35 }
  0x9f   :  { %v258_v47 = vpack.c.bf16 %v211_v40, %v209_v43 }
  0xa2   :  { %v239_v31 = vpop.f32.mrf.mxu2 }
  0xa3   :  { %v240_v49 = vadd.f32 %v239_v31, %v1110_v35  ;;  %v1146_v31 = vpop.permute.xlu0 %146 }
  0xa4   :  { %v213_v32 = vpop.f32.mrf.mxu1 }
  0xa5   :  { %v214_v38 = vadd.f32 %v213_v32, %v1104_v29  ;;  %v259_v52 = vpack.c.bf16 %v240_v49, %v238_v51 }
  0xaa   :  { %v242_v33 = vpop.f32.mrf.mxu2 }
  0xab   :  { %v243_v45 = vadd.f32 %v242_v33, %v1104_v29 }
  0xac   :  { %v215_v37 = vpop.f32.mrf.mxu1 }
  0xad   :  { %v216_v39 = vadd.f32 %v215_v37, %v1108_v34 }
  0xaf   :  { %v260_v41 = vpack.c.bf16 %v216_v39, %v214_v38 }
  0xb1   :  { %271 = vmatpush.bf16.msra.mxu3 %v260_v41  ;;  %v354_v41 = vld.sshfl [vmem:[#allocation1] sm:$0xff pattern:$0x75316420] }
  0xb2   :  { %v244_v44 = vpop.f32.mrf.mxu2  ;;  %v358_v43 = vpack.c.bf16 %v354_v41, %v354_v41 }
  0xb3   :  { %v245_v46 = vadd.f32 %v244_v44, %v1108_v34  ;;  %v359_v44 = vpack.c.bf16 %v355_v42, %v355_v42 }
  0xb4   :  { %v218_v63 = vpop.f32.mrf.mxu1 }
  0xb5   :  { %272 = vmatpush.bf16.msra.mxu3 %v258_v47  ;;  %v261_v50 = vpack.c.bf16 %v245_v46, %v243_v45  ;;  %v219_v37 = vadd.f32 %v218_v63, %v1136_v11  ;;  %v361_v45 = vsel %vm192_vm0, %v358_v43, 0  ;;  %v364_v46 = vsel %vm192_vm0, %v359_v44, 0 }
  0xb7   :  { %284 = vmatpush.bf16.msrb.mxu0 %v261_v50 }
  0xb8   :  { %810 = vmatmul.msk.bf16.vlgmr.msra.gmra.mxu3 %vm77_vm1, %v1121_v48 }
  0xba   :  { %v247_v0 = vpop.f32.mrf.mxu2 }
  0xbb   :  { %285 = vmatpush.bf16.msrb.mxu0 %v259_v52  ;;  %v248_v38 = vadd.f32 %v247_v0, %v1136_v11 }
  0xbc   :  { %v220_v1 = vpop.f32.mrf.mxu1 }
  0xbd   :  { %v221_v33 = vadd.f32 %v220_v1, %v1146_v31 }
  0xbe   :  { %811 = vmatmul.msk.bf16.vlgmr.msrb.gmra.mxu0 %vm77_vm1, %v1121_v48 }
  0xbf   :  { %v314_v40 = vpack.c.bf16 %v221_v33, %v219_v37 }
  0xc2   :  { %v249_v2 = vpop.f32.mrf.mxu2 }
  0xc3   :  { %v250_v36 = vadd.f32 %v249_v2, %v1146_v31 }
  0xc4   :  { %v223_v4 = vpop.f32.mrf.mxu1 }
  0xc5   :  { %v315_v39 = vpack.c.bf16 %v250_v36, %v248_v38 }
  0xca   :  { %v252_v5 = vpop.f32.mrf.mxu2 }
  0xcc   :  { %v225_v12 = vpop.f32.mrf.mxu1 }
  0xcd   :  { %v226_v15 = vadd.f32 %v225_v12, %v1134_v3  ;;  %v429_v12 = vrot.slane %v1121_v48, 1 }
  0xd2   :  { %v254_v13 = vpop.f32.mrf.mxu2 }
  0xd3   :  { %v255_v16 = vadd.f32 %v254_v13, %v1134_v3 }
 0x13b   :  { %v274_v53 = vpop.f32.mrf.mxu3  ;;  %v287_v54 = vpop.f32.mrf.mxu0 }
 0x13c   :  { %v291_v55 = vmul.f32 0.17677669, %v274_v53  ;;  %v292_v56 = vmul.f32 0.17677669, %v287_v54 }
 0x13e   :  { %v293_v57 = vsel %vm192_vm0, %v291_v55, -inf  ;;  %v294_v58 = vsel %vm192_vm0, %v292_v56, -inf }
 0x13f   :  { %v295_v59 = vmax.f32 %v293_v57, %v294_v58 }
 0x141   :  { %296 = vmax.xlane.f32.xlu2 %v295_v59 }
 0x143   :  { %v276_v60 = vpop.f32.mrf.mxu3  ;;  %v289_v61 = vpop.f32.mrf.mxu0 }
 0x159   :  { %151 = vperm.xlu2 %878, %v108_v62  }
 0x1b4   :  { %v297_v6 = vpop.xlane.xlu2 %296 }
 0x1b5   :  { %v298_v7 = vsub.f32 %v291_v55, %v297_v6  ;;  %v299_v8 = vsub.f32 %v292_v56, %v297_v6 }
 0x1b7   :  { %v300_v9 = vmul.f32 1.442695, %v298_v7  ;;  %v302_v10 = vmul.f32 1.442695, %v299_v8 }
 0x1b9   :  { %892 = vpow2.f32 %v300_v9 }
 0x1ba   :  { %894 = vpow2.f32 %v302_v10 }
 0x1bc   :  { %v1138_v14 = vpop.permute.xlu2 %151 }
 0x1bd   :  { %v253_v18 = vadd.f32 %v252_v5, %v1138_v14  ;;  %v224_v19 = vadd.f32 %v223_v4, %v1138_v14 }
 0x1bf   :  { %v893_v21 = vpop.eup %892  ;;  %v316_v24 = vpack.c.bf16 %v226_v15, %v224_v19  ;;  %v317_v25 = vpack.c.bf16 %v255_v16, %v253_v18 }
 0x1c0   :  { %v895_v26 = vpop.eup %894  ;;  %v304_v27 = vsel %vm192_vm0, %v893_v21, 0.0 }
 0x1c1   :  { %324 = vmatpush.bf16.xpose.msrb.mxu3 %v316_v24  ;;  %337 = vmatpush.bf16.xpose.msra.mxu0 %v317_v25  ;;  %v305_v28 = vsel %vm192_vm0, %v895_v26, 0.0 }
 0x1c2   :  { %v306_v32 = vadd.f32 %v305_v28, %v304_v27 }
 0x1c4   :  { %307 = vadd.xlane.f32.xlu1 %v306_v32 }
 0x1c9   :  { %325 = vmatpush.bf16.xpose.msrb.mxu3 %v314_v40  ;;  %338 = vmatpush.bf16.xpose.msra.mxu0 %v315_v39 }
 0x1d1   :  { %373 = vmatpush.bf16.msra.mxu3 %v361_v45  ;;  %402 = vmatpush.bf16.msrb.mxu0 %v364_v46 }
 0x237   :  { %v308_v47 = vpop.xlane.xlu1 %307 }
 0x238   :  { %896 = vrcp.f32 %v308_v47 }
 0x23e   :  { %v897_v49 = vpop.eup %896 }
 0x23f   :  { %v311_v50 = vmul.f32 %v897_v49, %v895_v26  ;;  %v310_v51 = vmul.f32 %v897_v49, %v893_v21 }
 0x241   :  { %v312_v52 = vpack.c.bf16 %v310_v51, %v310_v51  ;;  %v313_v53 = vpack.c.bf16 %v311_v50, %v311_v50 }
 0x243   :  { %326 = vmatmul.bf16.vlgmr.msrb.gmra.mxu3 %v312_v52  ;;  %339 = vmatmul.bf16.vlgmr.msra.gmra.mxu0 %v313_v53 }
 0x253   :  { %813 = vmatmul.msk.bf16.vlgmr.msra.gmra.mxu3 %vm179_vm2, %v1061_v17  ;;  %817 = vmatmul.msk.bf16.vlgmr.msrb.gmra.mxu0 %vm179_vm2, %v1061_v17 }
 0x263   :  { %814 = vmatmul.msk.bf16.gmra.mxu3 %vm179_vm2, %v1077_v20  ;;  %818 = vmatmul.msk.bf16.gmra.mxu0 %vm179_vm2, %v1077_v20 }
 0x273   :  { %815 = vmatmul.msk.bf16.gmra.mxu3 %vm179_vm2, %v1089_v22  ;;  %819 = vmatmul.msk.bf16.gmra.mxu0 %vm179_vm2, %v1089_v22 }
 0x283   :  { %816 = vmatmul.msk.bf16.gmra.mxu3 %vm179_vm2, %v1098_v23  ;;  %820 = vmatmul.msk.bf16.gmra.mxu0 %vm179_vm2, %v1098_v23 }
 0x2c0   :  { %v340_v54 = vpop.f32.mrf.mxu0 }
 0x2c6   :  { %v327_v17 = vpop.f32.mrf.mxu3 }
 0x2c7   :  { %v1170_v55 = vadd.f32 %v340_v54, %v327_v17 }
 0x2c8   :  { %v342_v56 = vpop.f32.mrf.mxu0 }
 0x2ce   :  { %v329_v57 = vpop.f32.mrf.mxu3 }
 0x2d0   :  { %v404_v58 = vpop.f32.mrf.mxu0 }
 0x2d1   :  { %v405_v2 = vadd.f32 %v404_v58, %v1106_v30 }
 0x2d6   :  { %v375_v20 = vpop.f32.mrf.mxu3 }
 0x2d7   :  { %v376_v13 = vadd.f32 %v375_v20, %v1106_v30 }
 0x2d8   :  { %v406_v59 = vpop.f32.mrf.mxu0 }
 0x2d9   :  { %v407_v1 = vadd.f32 %v406_v59, %v1110_v35 }
 0x2db   :  { %v425_v7 = vpack.c.bf16 %v407_v1, %v405_v2  ;;  %v345_v1 = vrot.slane %v1170_v55, 1 }
 0x2de   :  { %v377_v60 = vpop.f32.mrf.mxu3 }
 0x2df   :  { %v378_v9 = vadd.f32 %v377_v60, %v1110_v35  ;;  %v867_v60 = vld [vmem:[%s1259_s6 + $0x18] sm:$0xff] }
 0x2e0   :  { %v409_v61 = vpop.f32.mrf.mxu0 }
 0x2e1   :  { %v410_v22 = vadd.f32 %v409_v61, %v1104_v29  ;;  %v424_v15 = vpack.c.bf16 %v378_v9, %v376_v13  ;;  %v866_v61 = vld [vmem:[%s1259_s6 + $0x10] sm:$0xff] }
 0x2e6   :  { %v380_v62 = vpop.f32.mrf.mxu3 }
 0x2e7   :  { %v381_v5 = vadd.f32 %v380_v62, %v1104_v29 }
 0x2e8   :  { %v411_v63 = vpop.f32.mrf.mxu0 }
 0x2e9   :  { %v412_v0 = vadd.f32 %v411_v63, %v1108_v34 }
 0x2eb   :  { %v427_v23 = vpack.c.bf16 %v412_v0, %v410_v22 }
 0x2ed   :  { %452 = vmatpush.bf16.msrb.mxu2 %v427_v23 }
 0x2ee   :  { %v382_v4 = vpop.f32.mrf.mxu3 }
 0x2ef   :  { %v383_v6 = vadd.f32 %v382_v4, %v1108_v34 }
 0x2f0   :  { %v414_v8 = vpop.f32.mrf.mxu0 }
 0x2f1   :  { %453 = vmatpush.bf16.msrb.mxu2 %v425_v7  ;;  %v426_v10 = vpack.c.bf16 %v383_v6, %v381_v5  ;;  %v415_v28 = vadd.f32 %v414_v8, %v1136_v11  ;;  %v865_v5 = vld [vmem:[%s1259_s6 + $0x8] sm:$0xff]  ;;  %v864_v6 = vld [vmem:[%s1259_s6] sm:$0xff] }
 0x2f3   :  { %439 = vmatpush.bf16.msrb.mxu1 %v426_v10 }
 0x2f4   :  { %822 = vmatmul.msk.bf16.vlgmr.msrb.gmra.mxu2 %vm77_vm1, %v429_v12 }
 0x2f6   :  { %v385_v16 = vpop.f32.mrf.mxu3 }
 0x2f7   :  { %440 = vmatpush.bf16.msrb.mxu1 %v424_v15  ;;  %v386_v37 = vadd.f32 %v385_v16, %v1136_v11 }
 0x2f8   :  { %v416_v18 = vpop.f32.mrf.mxu0 }
 0x2f9   :  { %v417_v25 = vadd.f32 %v416_v18, %v1146_v31  ;;  %v942_v18 = vmov 2.0  }
 0x2fa   :  { %821 = vmatmul.msk.bf16.vlgmr.msrb.gmra.mxu1 %vm77_vm1, %v429_v12 }
 0x2fb   :  { %v483_v33 = vpack.c.bf16 %v417_v25, %v415_v28 }
 0x2fe   :  { %v387_v29 = vpop.f32.mrf.mxu3 }
 0x2ff   :  { %v388_v36 = vadd.f32 %v387_v29, %v1146_v31 }
 0x300   :  { %v419_v34 = vpop.f32.mrf.mxu0 }
 0x301   :  { %v420_v35 = vadd.f32 %v419_v34, %v1138_v14  ;;  %v482_v38 = vpack.c.bf16 %v388_v36, %v386_v37  ;;  %v885_v34 = vld [vmem:[%s1260_s7] ss:$0 sm:$0xff] }
 0x306   :  { %v390_v19 = vpop.f32.mrf.mxu3 }
 0x307   :  { %v391_v26 = vadd.f32 %v390_v19, %v1138_v14 }
 0x308   :  { %v421_v21 = vpop.f32.mrf.mxu0 }
 0x309   :  { %v422_v24 = vadd.f32 %v421_v21, %v1134_v3 }
 0x30b   :  { %v485_v48 = vpack.c.bf16 %v422_v24, %v420_v35 }
 0x30d   :  { %505 = vmatpush.bf16.xpose.msra.mxu2 %v485_v48 }
 0x30e   :  { %v392_v30 = vpop.f32.mrf.mxu3 }
 0x30f   :  { %v393_v27 = vadd.f32 %v392_v30, %v1134_v3 }
 0x311   :  { %v484_v32 = vpack.c.bf16 %v393_v27, %v391_v26 }
 0x313   :  { %492 = vmatpush.bf16.xpose.msra.mxu1 %v484_v32 }
 0x315   :  { %506 = vmatpush.bf16.xpose.msra.mxu2 %v483_v33 }
 0x31b   :  { %493 = vmatpush.bf16.xpose.msra.mxu1 %v482_v38 }
 0x323   :  { %568 = vmatpush.bf16.msrb.mxu1 %v867_v60 }
 0x327   :  { %569 = vmatpush.bf16.msrb.mxu1 %v866_v61 }
 0x32b   :  { %570 = vmatpush.bf16.msrb.mxu1 %v865_v5 }
 0x32f   :  { %571 = vmatpush.bf16.msrb.mxu1 %v864_v6 }
 0x377   :  { %v442_v39 = vpop.f32.mrf.mxu1  ;;  %v455_v40 = vpop.f32.mrf.mxu2 }
 0x378   :  { %v459_v41 = vmul.f32 0.17677669, %v442_v39  ;;  %v460_v42 = vmul.f32 0.17677669, %v455_v40 }
 0x37a   :  { %v461_v14 = vsel %vm192_vm0, %v459_v41, -inf  ;;  %v462_v3 = vsel %vm192_vm0, %v460_v42, -inf }
 0x37b   :  { %v463_v43 = vmax.f32 %v461_v14, %v462_v3  ;;  %v869_v14 = vld [vmem:[%s1263_s10 + $0x8] sm:$0xff] }
 0x37c   :  { %656 = vmatpush.bf16.msrb.mxu2 %v869_v14 }
 0x37d   :  { %464 = vmax.xlane.f32.xlu2 %v463_v43 }
 0x37f   :  { %v444_v44 = vpop.f32.mrf.mxu1  ;;  %v457_v45 = vpop.f32.mrf.mxu2 }
 0x380   :  { %v868_v44 = vld [vmem:[%s1263_s10] sm:$0xff] }
 0x381   :  { %657 = vmatpush.bf16.msrb.mxu2 %v868_v44 }
 0x3f0   :  { %v465_v46 = vpop.xlane.xlu2 %464 }
 0x3f1   :  { %v466_v47 = vsub.f32 %v459_v41, %v465_v46  ;;  %v467_v31 = vsub.f32 %v460_v42, %v465_v46 }
 0x3f3   :  { %v468_v49 = vmul.f32 1.442695, %v466_v47  ;;  %v470_v50 = vmul.f32 1.442695, %v467_v31 }
 0x3f5   :  { %898 = vpow2.f32 %v468_v49 }
 0x3f6   :  { %900 = vpow2.f32 %v470_v50 }
 0x3fb   :  { %v899_v11 = vpop.eup %898 }
 0x3fc   :  { %v901_v51 = vpop.eup %900  ;;  %v472_v52 = vsel %vm192_vm0, %v899_v11, 0.0 }
 0x3fd   :  { %v473_v53 = vsel %vm192_vm0, %v901_v51, 0.0 }
 0x3fe   :  { %v474_v54 = vadd.f32 %v473_v53, %v472_v52  ;;  %v886_v53 = vld [vmem:[%s1261_s8] ss:$0 sm:$0xff] }
 0x400   :  { %475 = vadd.xlane.f32.xlu0 %v474_v54 }
 0x473   :  { %v476_v17 = vpop.xlane.xlu0 %475 }
 0x474   :  { %902 = vrcp.f32 %v476_v17 }
 0x475   :  { %904 = vrcp.f32 %v942_v18 }
 0x47a   :  { %v903_v56 = vpop.eup %902 }
 0x47b   :  { %v478_v57 = vmul.f32 %v903_v56, %v899_v11  ;;  %v479_v58 = vmul.f32 %v903_v56, %v901_v51  ;;  %v905_v29 = vpop.eup %904 }
 0x47c   :  { %v588_v19 = vmul.f32 2.0, %v905_v29  ;;  %vm592_vm6 = vweird.f32 %v905_v29 }
 0x47d   :  { %v480_v20 = vpack.c.bf16 %v478_v57, %v478_v57  ;;  %v481_v59 = vpack.c.bf16 %v479_v58, %v479_v58  ;;  %v887_v57 = vld [vmem:[%s1262_s9] ss:$0 sm:$0xff] }
 0x47e   :  { %v589_v24 = vsub.f32 1.0, %v588_v19 }
 0x47f   :  { %494 = vmatmul.bf16.vlgmr.msra.gmra.mxu1 %v480_v20  ;;  %507 = vmatmul.bf16.vlgmr.msra.gmra.mxu2 %v481_v59 }
 0x4fc   :  { %v495_v62 = vpop.f32.mrf.mxu1 }
 0x502   :  { %v508_v63 = vpop.f32.mrf.mxu2 }
 0x503   :  { %v509_v22 = vadd.f32 %v508_v63, %v495_v62  ;;  %v888_v62 = vld [vmem:[%s1264_s11] ss:$0 sm:$0xff] }
 0x504   :  { %v497_v0 = vpop.f32.mrf.mxu1 }
 0x505   :  { %v513_v23 = vrot.slane %v509_v22, 1 }
 0x507   :  { %v879_v2 = vpack.i.bf16 %v345_v1, %v513_v23 }
 0x509   :  { %880 = vrot.lane.b32.xlu1 %v879_v2, %s941_s25 }
 0x50a   :  { %v510_v4 = vpop.f32.mrf.mxu2 }
 0x57b   :  { %v881_v7 = vpop.permute.xlu1 %880 }
 0x57c   :  { %v883_v8 = vunpack.i.h.bf16 %v881_v7  ;;  %v882_v9 = vunpack.i.l.bf16 %v881_v7 }
 0x57e   :  { %v517_v10 = vsel %vm77_vm1, %v509_v22, %v882_v9  ;;  %v349_v13 = vsel %vm77_vm1, %v1170_v55, %v883_v8  ;;  %v590_v55 = vmul.f32 %v905_v29, %v589_v24 }
 0x57f   :  { %v519_v12 = vrot.slane %v517_v10, 7 }
 0x580   :  { %v591_v28 = vadd.f32 %v905_v29, %v590_v55 }
 0x581   :  { %v522_v15 = vsel %vm521_vm3, %v349_v13, %v519_v12 }
 0x582   :  { %v523_v16 = vpack.c.bf16 %v522_v15, %v522_v15  ;;  %v593_v36 = vsel %vm592_vm6, %v905_v29, %v591_v28  ;;  %v871_v15 = vld [vmem:[%s1267_s14 + $0x8] sm:$0xff]  ;;  %v870_v29 = vld [vmem:[%s1267_s14] sm:$0xff] }
 0x583   :  { %734 = vmatpush.bf16.msrb.mxu3 %v871_v15 }
 0x584   :  { %839 = vmatmul.msk.bf16.vlgmr.msrb.gmra.mxu1 %vm560_vm4, %v523_v16 }
 0x587   :  { %735 = vmatpush.bf16.msrb.mxu3 %v870_v29 }
 0x601   :  { %v573_v21 = vpop.f32.mrf.mxu1 }
 0x602   :  { %v574_v35 = vadd.f32 %v885_v34, %v573_v21 }
 0x604   :  { %v580_v48 = vsel %vm579_vm5, %v574_v35, 0.0 }
 0x605   :  { %v581_v30 = vrot.slane %v580_v48, 4 }
 0x607   :  { %v582_v25 = vadd.f32 %v581_v30, %v580_v48 }
 0x609   :  { %v583_v26 = vrot.slane %v582_v25, 2  ;;  %v575_v27 = vpop.f32.mrf.mxu1 }
 0x60b   :  { %v584_v32 = vadd.f32 %v583_v26, %v582_v25  ;;  %v889_v26 = vld [vmem:[%s1265_s12] ss:$0 sm:$0xff]  ;;  %s943_s12 = smov [#allocation2]  }
 0x60d   :  { %v585_v33 = vrot.slane %v584_v32, 1 }
 0x60f   :  { %v586_v37 = vadd.f32 %v585_v33, %v584_v32  ;;  %v890_v33 = vld [vmem:[%s1266_s13] ss:$0 sm:$0xff]  ;;  %s766_s13 = sshll.u32 %s943_s12, 4  ;;  %s767_s13 = int_to_ptr.vmem [resolvable:$true] %s766_s13 }
 0x611   :  { %v594_v38 = vmul.f32 %v593_v36, %v586_v37 }
 0x613   :  { %v595_v39 = vsub.f32 %v574_v35, %v594_v38 }
 0x615   :  { %v596_v40 = vmul.f32 %v595_v39, %v595_v39  ;;  %v608_v56 = vmul.f32 %v886_v53, %v595_v39 }
 0x617   :  { %v597_v41 = vsel %vm579_vm5, %v596_v40, 0.0 }
 0x618   :  { %v598_v42 = vrot.slane %v597_v41, 4 }
 0x61a   :  { %v599_v3 = vadd.f32 %v598_v42, %v597_v41  ;;  %v891_v41 = vld [vmem:[%s1268_s15] ss:$0 sm:$0xff] }
 0x61c   :  { %v600_v43 = vrot.slane %v599_v3, 2 }
 0x61e   :  { %v601_v45 = vadd.f32 %v600_v43, %v599_v3 }
 0x620   :  { %v602_v46 = vrot.slane %v601_v45, 1 }
 0x622   :  { %v603_v47 = vadd.f32 %v602_v46, %v601_v45 }
 0x624   :  { %v604_v31 = vmul.f32 %v603_v47, %v593_v36 }
 0x626   :  { %v609_v49 = vadd.f32 1e-05, %v604_v31 }
 0x628   :  { %906 = vrsqrt.f32 %v609_v49  ;;  %vm616_vm8 = vweird.f32 %v609_v49 }
 0x62e   :  { %v907_v50 = vpop.eup %906 }
 0x62f   :  { %v611_v11 = vmul.f32 %v907_v50, %v609_v49  ;;  %vm617_vm7 = vweird.f32 %v907_v50 }
 0x630   :  { %vm618_vm9 = vmor %vm616_vm8, %vm617_vm7 }
 0x631   :  { %v612_v51 = vmul.f32 %v907_v50, %v611_v11 }
 0x633   :  { %v613_v52 = vmul.f32 0.5, %v612_v51 }
 0x635   :  { %v614_v54 = vsub.f32 1.5, %v613_v52 }
 0x637   :  { %v615_v17 = vmul.f32 %v907_v50, %v614_v54 }
 0x639   :  { %v619_v58 = vsel %vm618_vm9, %v907_v50, %v615_v17 }
 0x63a   :  { %v620_v20 = vmul.f32 %v619_v58, %v608_v56 }
 0x63c   :  { %v624_v59 = vadd.f32 %v887_v57, %v620_v20 }
 0x63e   :  { %v625_v60 = vmax.f32 %v624_v59, 0.0 }
 0x640   :  { %v626_v61 = vpack.c.bf16 %v625_v60, %v625_v60 }
 0x642   :  { %848 = vmatmul.msk.bf16.vlgmr.msrb.gmra.mxu2 %vm77_vm1, %v626_v61 }
 0x6c5   :  { %v659_v63 = vpop.f32.mrf.mxu2 }
 0x6c6   :  { %v660_v22 = vadd.f32 %v888_v62, %v659_v63 }
 0x6c8   :  { %v665_v0 = vsel %vm579_vm5, %v660_v22, 0.0 }
 0x6c9   :  { %v666_v1 = vrot.slane %v665_v0, 4 }
 0x6cb   :  { %v667_v23 = vadd.f32 %v666_v1, %v665_v0 }
 0x6cd   :  { %v668_v2 = vrot.slane %v667_v23, 2  ;;  %v661_v4 = vpop.f32.mrf.mxu2 }
 0x6cf   :  { %v669_v5 = vadd.f32 %v668_v2, %v667_v23 }
 0x6d1   :  { %v670_v6 = vrot.slane %v669_v5, 1 }
 0x6d3   :  { %v671_v7 = vadd.f32 %v670_v6, %v669_v5 }
 0x6d5   :  { %v672_v8 = vmul.f32 %v671_v7, %v593_v36 }
 0x6d7   :  { %v673_v9 = vsub.f32 %v660_v22, %v672_v8 }
 0x6d9   :  { %v674_v10 = vmul.f32 %v673_v9, %v673_v9  ;;  %v686_v32 = vmul.f32 %v889_v26, %v673_v9 }
 0x6db   :  { %v675_v12 = vsel %vm579_vm5, %v674_v10, 0.0 }
 0x6dc   :  { %v676_v13 = vrot.slane %v675_v12, 4 }
 0x6de   :  { %v677_v16 = vadd.f32 %v676_v13, %v675_v12 }
 0x6e0   :  { %v678_v18 = vrot.slane %v677_v16, 2 }
 0x6e2   :  { %v679_v34 = vadd.f32 %v678_v18, %v677_v16 }
 0x6e4   :  { %v680_v19 = vrot.slane %v679_v34, 1 }
 0x6e6   :  { %v681_v21 = vadd.f32 %v680_v19, %v679_v34 }
 0x6e8   :  { %v682_v35 = vmul.f32 %v681_v21, %v593_v36 }
 0x6ea   :  { %v687_v24 = vadd.f32 1e-05, %v682_v35 }
 0x6ec   :  { %908 = vrsqrt.f32 %v687_v24  ;;  %vm694_vm11 = vweird.f32 %v687_v24 }
 0x6f2   :  { %v909_v48 = vpop.eup %908 }
 0x6f3   :  { %v689_v30 = vmul.f32 %v909_v48, %v687_v24  ;;  %vm695_vm10 = vweird.f32 %v909_v48 }
 0x6f4   :  { %vm696_vm12 = vmor %vm694_vm11, %vm695_vm10 }
 0x6f5   :  { %v690_v55 = vmul.f32 %v909_v48, %v689_v30 }
 0x6f7   :  { %v691_v25 = vmul.f32 0.5, %v690_v55 }
 0x6f9   :  { %v692_v27 = vsub.f32 1.5, %v691_v25 }
 0x6fb   :  { %v693_v28 = vmul.f32 %v909_v48, %v692_v27 }
 0x6fd   :  { %v697_v36 = vsel %vm696_vm12, %v909_v48, %v693_v28 }
 0x6fe   :  { %v698_v37 = vmul.f32 %v697_v36, %v686_v32 }
 0x700   :  { %v702_v38 = vadd.f32 %v890_v33, %v698_v37 }
 0x702   :  { %v703_v39 = vmax.f32 %v702_v38, 0.0 }
 0x704   :  { %v704_v40 = vpack.c.bf16 %v703_v39, %v703_v39 }
 0x706   :  { %857 = vmatmul.msk.bf16.vlgmr.msrb.gmra.mxu3 %vm77_vm1, %v704_v40 }
 0x789   :  { %v737_v42 = vpop.f32.mrf.mxu3 }
 0x78a   :  { %v738_v14 = vadd.f32 %v891_v41, %v737_v42 }
 0x78c   :  { %v741_v3 = vsub.f32 0.0, %v738_v14 }
 0x78e   :  { %v742_v43 = vmul.f32 1.442695, %v741_v3 }
 0x790   :  { %910 = vpow2.f32 %v742_v43 }
 0x791   :  { %v739_v44 = vpop.f32.mrf.mxu3 }
 0x796   :  { %v911_v45 = vpop.eup %910 }
 0x797   :  { %v744_v46 = vadd.f32 1.0, %v911_v45 }
 0x799   :  { %912 = vrcp.f32 %v744_v46  ;;  %v756_v50 = vand.u32 2147483648, %v744_v46  ;;  %v754_v51 = vand.u32 2147483647, %v744_v46  ;;  %vm750_vm14 = vweird.f32 %v744_v46 }
 0x79b   :  { %v757_v53 = vor.u32 1.1754944e-38, %v756_v50  ;;  %vm755_vm0 = vcmp.eq.f32.partialorder %v754_v51, 8.507059e+37 }
 0x79f   :  { %v913_v47 = vpop.eup %912 }
 0x7a0   :  { %v746_v31 = vmul.f32 %v913_v47, %v744_v46  ;;  %vm751_vm13 = vweird.f32 %v913_v47 }
 0x7a1   :  { %vm752_vm15 = vmor %vm750_vm14, %vm751_vm13 }
 0x7a2   :  { %v747_v49 = vsub.f32 1.0, %v746_v31 }
 0x7a4   :  { %v748_v11 = vmul.f32 %v913_v47, %v747_v49 }
 0x7a6   :  { %v749_v52 = vadd.f32 %v913_v47, %v748_v11 }
 0x7a8   :  { %v753_v54 = vsel %vm752_vm15, %v913_v47, %v749_v52 }
 0x7a9   :  { %v758_v17 = vsel %vm755_vm0, %v757_v53, %v753_v54 }
 0x7aa   :  { %760 = vst [vmem:[#allocation2] sm:$0x3] %v758_v17 }
 0x7ab   :  { %771 = dma.vmem_to_hbm [thread:$0]  %s767_s13, 32, %s769_s26, [#allocation3]  }
 0x7ac   :  { %938 = dma.done.wait [#allocation3], 32  }
 0x7ad   :  { %939 = vsyncadd [#allocation3], 4294967264 }
 0x7ae   :  { %776 = vsyncpa [#allocation3], 1 }

</bundles_post_ra>
